<compile_context>
chip_gen: v7x
topology: tpu7x:2x2x1
jax: 0.10.0
libtpu: 0.0.40
codegen_flags: <defaults>
</compile_context>

<pallas_src>
import functools

import jax
import jax.numpy as jnp
from jax.experimental import pallas as pl
from jax.experimental.pallas import tpu as pltpu

_LANE = 128
_MIB = 1024 * 1024


def _round_up(x, m):
    return -(-x // m) * m


def _round_down(x, m):
    return (x // m) * m


def _tpu_vmem_capacity_bytes():
    """Physical per-core VMEM (0 if it cannot be queried)."""
    try:
        info = pltpu.get_tpu_info()
        cap = int(getattr(info, "vmem_capacity_bytes", 0) or 0)
        return cap if cap > 0 else 0
    except Exception:
        return 0


def _sizing(dtype, d, narrow):
    """Generation-aware row-tile / VMEM-limit selection."""
    itemsize = jnp.dtype(dtype).itemsize
    # Native sublane packing: 8 rows (4B), 16 rows (2B), 32 rows (1B).
    sublane = max(8, 32 // max(1, itemsize))

    cap = _tpu_vmem_capacity_bytes()
    if cap >= 96 * _MIB:
        # v5e / v6e: 128 MiB VMEM, <=1.4 TB/s HBM.
        vmem_limit = min(64 * _MIB, cap // 2)
        max_rows = 2048
        min_grid_steps = 1
    elif cap > 0:
        # v7x-like: 64 MiB VMEM per core, ~3.2 TB/s HBM, 2 TCs share the grid.
        vmem_limit = min(40 * _MIB, int(cap * 0.625))
        max_rows = 4096
        min_grid_steps = 4
    else:
        # Unknown hardware: conservative numbers that are safe everywhere.
        vmem_limit = 32 * _MIB
        max_rows = 2048
        min_grid_steps = 1

    budget = int(vmem_limit * 0.6)  # sizing budget tied to the compiler limit

    pad_d = _round_up(d, _LANE)
    if narrow:
        # 1 input tile (rows, 2D) + 2 output tiles (rows, D), double-buffered.
        pad_2d = _round_up(2 * d, _LANE)
        bytes_per_row = 2 * (pad_2d + 2 * pad_d) * itemsize
    else:
        # 2 input tiles + 2 output tiles of (rows, D), double-buffered.
        bytes_per_row = 8 * pad_d * itemsize

    rows_fit = max(sublane, budget // bytes_per_row)
    rows_tile = min(max_rows, rows_fit)
    rows_tile = max(sublane, _round_down(rows_tile, sublane))

    # Make sure the compiler limit covers the actual footprint (+ headroom),
    # without ever exceeding a safe fraction of physical VMEM.
    footprint = rows_tile * bytes_per_row
    hard_cap = (cap - 16 * _MIB) if cap >= 96 * _MIB else 48 * _MIB
    vmem_limit = max(vmem_limit, min(hard_cap, footprint + 4 * _MIB))

    return rows_tile, sublane, vmem_limit, min_grid_steps


def _split_copy_kernel(x_even_ref, x_odd_ref, even_ref, odd_ref):
    # Wide-D path: even/odd selection already happened in the input DMAs
    # (phase-selecting index_maps); the body is a pure VMEM copy.
    even_ref[...] = x_even_ref[...]
    odd_ref[...] = x_odd_ref[...]


def _split_narrow_kernel(x_ref, even_ref, odd_ref, *, d):
    # Narrow-D path: one contiguous (rows, 2*D) DMA per step; de-interleave in
    # VMEM with lane sub-slices (free under the HBM-bandwidth bound).
    x = x_ref[...]
    even_ref[...] = x[:, :d]
    odd_ref[...] = x[:, d:]


def splitting(x):
    """Pallas equivalent of Splitting.forward: returns (even, odd)."""
    B, T, D = x.shape
    if T % 2 != 0:
        raise ValueError("sequence length (dim 1) must be even")
    t_half = T // 2
    R = B * t_half  # output rows per phase

    itemsize = jnp.dtype(x.dtype).itemsize
    narrow = D * itemsize < 512  # small feature rows -> contiguous-DMA path

    rows_tile, sublane, vmem_limit, min_steps = _sizing(x.dtype, D, narrow)

    if R <= rows_tile:
        rows_tile = R  # full-span block is always legal
    elif min_steps > 1:
        # Megacore: keep at least `min_steps` grid steps so both TCs get work.
        cap = max(sublane, _round_down(pl.cdiv(R, min_steps), sublane))
        rows_tile = min(rows_tile, cap)

    grid = (pl.cdiv(R, rows_tile),)
    cparams = pltpu.CompilerParams(
        dimension_semantics=("parallel",),
        vmem_limit_bytes=int(vmem_limit),
    )
    out_shape = (
        jax.ShapeDtypeStruct((R, D), x.dtype),
        jax.ShapeDtypeStruct((R, D), x.dtype),
    )
    out_specs = (
        pl.BlockSpec((rows_tile, D), lambda i: (i, 0)),
        pl.BlockSpec((rows_tile, D), lambda i: (i, 0)),
    )

    if narrow:
        # Free row-major view: row r = [even_row_r ; odd_row_r] along lanes.
        x2 = x.reshape(R, 2 * D)
        even2, odd2 = pl.pallas_call(
            functools.partial(_split_narrow_kernel, d=D),
            grid=grid,
            in_specs=[pl.BlockSpec((rows_tile, 2 * D), lambda i: (i, 0))],
            out_specs=out_specs,
            out_shape=out_shape,
            compiler_params=cparams,
        )(x2)
    else:
        # Free row-major view: middle axis is the even/odd phase.
        x3 = x.reshape(R, 2, D)
        even2, odd2 = pl.pallas_call(
            _split_copy_kernel,
            grid=grid,
            in_specs=[
                pl.BlockSpec((rows_tile, None, D), lambda i: (i, 0, 0)),
                pl.BlockSpec((rows_tile, None, D), lambda i: (i, 1, 0)),
            ],
            out_specs=out_specs,
            out_shape=out_shape,
            compiler_params=cparams,
        )(x3, x3)

    return even2.reshape(B, t_half, D), odd2.reshape(B, t_half, D)


if __name__ == "__main__":
    key = jax.random.PRNGKey(0)
    # Small shapes exercising: narrow-D path (aligned + ragged), wide-D path,
    # and a sub-32-bit dtype (bf16) on the narrow path.
    cases = [
        ((2, 8, 16), jnp.float32),    # narrow-D
        ((3, 10, 36), jnp.float32),   # narrow-D, non-8/128-aligned, ragged
        ((2, 8, 128), jnp.float32),   # wide-D (DMA-phase-split path)
        ((2, 6, 160), jnp.bfloat16),  # narrow-D, bf16 packing
    ]
    for (B, T, D), dt in cases:
        key, sub = jax.random.split(key)
        x = jax.random.normal(sub, (B, T, D), dtype=jnp.float32).astype(dt)

        even, odd = splitting(x)
        jax.block_until_ready(even)
        jax.block_until_ready(odd)

        # Reference: plain slicing (same semantics as the PyTorch module).
        ref_even = x[:, ::2, :]
        ref_odd = x[:, 1::2, :]
        assert even.shape == ref_even.shape and odd.shape == ref_odd.shape
        assert jnp.array_equal(even, ref_even), f"even mismatch for {(B, T, D, dt)}"
        assert jnp.array_equal(odd, ref_odd), f"odd mismatch for {(B, T, D, dt)}"

    print("KERNEL_OK")
</pallas_src>

<mosaic_0001>
module attributes {stable_mosaic.version = 11 : i64} {
  func.func @_split_narrow_kernel(%arg0: i32, %arg1: memref<8x32xf32, #tpu.memory_space<vmem>>, %arg2: memref<8x16xf32, #tpu.memory_space<vmem>>, %arg3: memref<8x16xf32, #tpu.memory_space<vmem>>) attributes {dimension_semantics = [#tpu.dimension_semantics<parallel>], iteration_bounds = array<i64: 1>, scalar_prefetch = 0 : i64, scratch_operands = 0 : i64, tpu.core_type = #tpu.core_type<tc>, window_params = [{transform_indices = @transform_0, window_bounds = array<i64: 8, 32>}, {transform_indices = @transform_1, window_bounds = array<i64: 8, 16>}, {transform_indices = @transform_2, window_bounds = array<i64: 8, 16>}]} {
    %c0 = arith.constant 0 : index
    %c0_0 = arith.constant 0 : index
    %0 = vector.load %arg1[%c0, %c0_0] : memref<8x32xf32, #tpu.memory_space<vmem>>, vector<8x32xf32>
    %1 = vector.extract_strided_slice %0 {offsets = [0, 0], sizes = [8, 16], strides = [1, 1]} : vector<8x32xf32> to vector<8x16xf32>
    %c0_1 = arith.constant 0 : index
    %c0_2 = arith.constant 0 : index
    %2 = vector.load %arg2[%c0_1, %c0_2] : memref<8x16xf32, #tpu.memory_space<vmem>>, vector<8x16xf32>
    tpu.vector_store %arg2[%c0_1, %c0_2], %1 {strides = array<i32>} : memref<8x16xf32, #tpu.memory_space<vmem>>, vector<8x16xf32>,
    %3 = vector.extract_strided_slice %0 {offsets = [0, 16], sizes = [8, 16], strides = [1, 1]} : vector<8x32xf32> to vector<8x16xf32>
    %c0_3 = arith.constant 0 : index
    %c0_4 = arith.constant 0 : index
    %4 = vector.load %arg3[%c0_3, %c0_4] : memref<8x16xf32, #tpu.memory_space<vmem>>, vector<8x16xf32>
    tpu.vector_store %arg3[%c0_3, %c0_4], %3 {strides = array<i32>} : memref<8x16xf32, #tpu.memory_space<vmem>>, vector<8x16xf32>,
    return
  }
  func.func @transform_0(%arg0: i32) -> (i32, i32) {
    %c0_i32 = arith.constant 0 : i32
    %c0_i32_0 = arith.constant 0 : i32
    return %arg0, %c0_i32 : i32, i32
  }
  func.func @transform_1(%arg0: i32) -> (i32, i32) {
    %c0_i32 = arith.constant 0 : i32
    %c0_i32_0 = arith.constant 0 : i32
    return %arg0, %c0_i32 : i32, i32
  }
  func.func @transform_2(%arg0: i32) -> (i32, i32) {
    %c0_i32 = arith.constant 0 : i32
    %c0_i32_0 = arith.constant 0 : i32
    return %arg0, %c0_i32 : i32, i32
  }
}

</mosaic_0001>

<bundles_post_ra>
// kernel: tpu_custom_call.1
= control target key start
LH: loop header
LB: loop body
LE: loop exit
PB: predicated region body
PF: predicated region fallthrough
CT: control target
= control target key end

     0   :  { %8 = vsyncpa [#allocation3], 0  ;;  %s194_s0 = inlined_call_operand.hbm [shape: f32[8,32], index: 0, kind: input, shape index: {}]   ;;  %s195_s1 = inlined_call_operand.hbm [shape: f32[8,16], index: 1, kind: output, shape index: {0}]   ;;  %s196_s2 = inlined_call_operand.hbm [shape: f32[8,16], index: 2, kind: output, shape index: {1}]  }
   0x1   :  { %9 = vsyncpa [#allocation4], 0 }
   0x2   :  { %10 = vsyncpa [#allocation7], 0  ;;  %s137_s9 = smov [#allocation2]   ;;  %s65_s13 = scalar_lea.hbm %s194_s0, 128 }
   0x3   :  { %s17_s10 = sshll.u32 %s137_s9, 4  ;;  %p66_p0 = scmp.ne.s32.totalorder %s194_s0, %s65_s13  ;;  %s18_s10 = int_to_ptr.vmem [resolvable:$true] %s17_s10 }
   0x4   :  { %p69_p1 = scmp.lt.u32.totalorder %s65_s13, %s194_s0 }
   0x6   :  { %p71_p2 = pnand %p69_p1, %p66_p0 }
   0x8   :  { %74 = shalt.err (!%p71_p2)
}
   0x9   :  { %s75_s18 = scalar_lea.vmem %s18_s10, 128  ;;  %p80_p4 = scmp.lt.s32.totalorder %s18_s10, %s18_s10 }
   0xa   :  { %p76_p3 = scmp.ne.s32.totalorder %s18_s10, %s75_s18  ;;  %p81_p5 = scmp.lt.s32.totalorder %s75_s18, %s75_s18 }
   0xc   :  { %p82_p6 = por %p81_p5, %p80_p4 }
   0xe   :  { %p83_p7 = pnand %p82_p6, %p76_p3 }
  0x10   :  { %86 = shalt.err (!%p83_p7)
}
  0x11   :  { %20 = dma.hbm_to_vmem [thread:$0]  %s194_s0, 128, %s18_s10, [#allocation3]  }
  0x12   :  { %131 = dma.done.wait [#allocation3], 128  }
  0x13   :  { %132 = vsyncadd [#allocation3], 4294967168  ;;  %s138_s21 = smov [#allocation5]   ;;  %vm25_vm0 = vcmask 130048   ;;  %v24_v0 = vld [vmem:[#allocation2] sm:$0xff]  ;;  %s139_s23 = smov 112  }
  0x14   :  { %s38_s22 = sshll.u32 %s138_s21, 4  ;;  %28 = vrot.lane.b32.xlu0 %v24_v0, %s139_s23  ;;  %26 = vst.msk [vmem:[#allocation5] sm:$0xff] %vm25_vm0, %v24_v0  ;;  %s39_s22 = int_to_ptr.vmem [resolvable:$true] %s38_s22 }
  0x15   :  { %s87_s24 = scalar_lea.vmem %s39_s22, 128  ;;  %p92_p9 = scmp.lt.s32.totalorder %s39_s22, %s39_s22 }
  0x16   :  { %p88_p8 = scmp.ne.s32.totalorder %s39_s22, %s87_s24  ;;  %p93_p10 = scmp.lt.s32.totalorder %s87_s24, %s87_s24 }
  0x18   :  { %p94_p11 = por %p93_p10, %p92_p9 }
  0x1a   :  { %p95_p12 = pnand %p94_p11, %p88_p8 }
  0x1c   :  { %98 = shalt.err (!%p95_p12)
}
  0x1d   :  { %s99_s26 = scalar_lea.hbm %s195_s1, 128 }
  0x1e   :  { %p100_p13 = scmp.ne.s32.totalorder %s195_s1, %s99_s26  ;;  %p103_p0 = scmp.lt.u32.totalorder %s99_s26, %s195_s1 }
  0x20   :  { %p105_p1 = pnand %p103_p0, %p100_p13 }
  0x22   :  { %108 = shalt.err (!%p105_p1)
}
  0x23   :  { %41 = dma.vmem_to_hbm [thread:$0]  %s39_s22, 128, %s195_s1, [#allocation4]  }
  0x24   :  { %s140_s5 = smov [#allocation6]  }
  0x25   :  { %s48_s6 = sshll.u32 %s140_s5, 4  ;;  %s49_s6 = int_to_ptr.vmem [resolvable:$true] %s48_s6 }
  0x26   :  { %s109_s7 = scalar_lea.vmem %s49_s6, 128  ;;  %p114_p3 = scmp.lt.s32.totalorder %s49_s6, %s49_s6 }
  0x27   :  { %p110_p2 = scmp.ne.s32.totalorder %s49_s6, %s109_s7  ;;  %p115_p4 = scmp.lt.s32.totalorder %s109_s7, %s109_s7 }
  0x29   :  { %p116_p5 = por %p115_p4, %p114_p3 }
  0x2b   :  { %p117_p6 = pnand %p116_p5, %p110_p2 }
  0x86   :  { %v29_v1 = vpop.permute.xlu0 %28 }
  0x87   :  { %31 = vst.msk [vmem:[#allocation6] sm:$0xff] %vm25_vm0, %v29_v1 }
  0x88   :  { %120 = shalt.err (!%p117_p6)
}
  0x89   :  { %s121_s10 = scalar_lea.hbm %s196_s2, 128 }
  0x8a   :  { %p122_p7 = scmp.ne.s32.totalorder %s196_s2, %s121_s10  ;;  %p125_p8 = scmp.lt.u32.totalorder %s121_s10, %s196_s2 }
  0x8c   :  { %p127_p9 = pnand %p125_p8, %p122_p7 }
  0x8e   :  { %130 = shalt.err (!%p127_p9)
}
  0x8f   :  { %51 = dma.vmem_to_hbm [thread:$0]  %s49_s6, 128, %s196_s2, [#allocation7]  }
  0x90   :  { %133 = dma.done.wait [#allocation4], 128  }
  0x91   :  { %134 = vsyncadd [#allocation4], 4294967168 }
  0x92   :  { %135 = dma.done.wait [#allocation7], 128  }
  0x93   :  { %136 = vsyncadd [#allocation7], 4294967168 }
  0x94   :  { %58 = vsyncpa [#allocation3], 1 }
  0x95   :  { %59 = vsyncpa [#allocation4], 1 }
  0x96   :  { %60 = vsyncpa [#allocation7], 1 }

</bundles_post_ra>
